<compile_context>
chip_gen: v7x
topology: tpu7x:2x2x1
jax: 0.10.0
libtpu: 0.0.40
codegen_flags: <defaults>
</compile_context>

<pallas_src>
import functools

import jax
import jax.numpy as jnp
from jax.experimental import pallas as pl
from jax.experimental.pallas import tpu as pltpu


# ----------------------------------------------------------------------------- helpers
def _round_up(x, m):
    return (x + m - 1) // m * m


def _pick_m_tile(M):
    """Largest row tile that divides M exactly (no pads), preferring >=2 grid
    blocks so both v7x TensorCores get work.  Falls back to a padded M."""
    for t in (512, 256, 128, 64, 32, 16):
        if M % t == 0 and M // t >= 2:
            return t, M
    for t in (512, 256, 128, 64, 32, 16):
        if M % t == 0:
            return t, M
    if M > 256:
        return 256, _round_up(M, 256)
    Mp = _round_up(M, 16)           # bf16 sublane packing -> multiple of 16
    return Mp, Mp


# ----------------------------------------------------------------------------- Pallas kernel
def _deconv_gemm_tanh_kernel(x_ref, w_ref, b_ref, o_ref):
    # x_ref: (tm, K) bf16   w_ref: (K, Ncp) bf16   b_ref: (1, Ncp) f32
    acc = jnp.dot(x_ref[...], w_ref[...], preferred_element_type=jnp.float32)
    o_ref[...] = jnp.tanh(acc + b_ref[...])


# ----------------------------------------------------------------------------- wrapper
def deconv2x2_tanh(x_nchw, w, b, out_pad=0):
    """tanh(ConvTranspose2d(k=2, s=2, p=0, output_padding=out_pad)(x)).

    x_nchw: (N, C_in, H, W)   w: (C_in, C_out, 2, 2)   b: (C_out,)
    Returns (N, C_out, 2H + out_pad, 2W + out_pad) in f32 (NCHW).
    """
    x = x_nchw.astype(jnp.float32)
    Nb, Cin, H, W = x.shape
    Cout = w.shape[1]

    # NCHW -> NHWC -> (M, K) activation matrix.
    x2d = jnp.transpose(x, (0, 2, 3, 1)).reshape(Nb * H * W, Cin)

    # Weight matrix: columns ordered (di, dj, co)  ->  (C_in, 4*C_out).
    Wmat = jnp.transpose(w, (0, 2, 3, 1)).reshape(Cin, 4 * Cout)
    bias4 = jnp.tile(b, 4)                                    # bias per column

    M, K = x2d.shape
    Nc = 4 * Cout
    Ncp = max(128, _round_up(Nc, 128))                        # lane-aligned output
    tm, Mp = _pick_m_tile(M)

    if Mp != M:
        x2d = jnp.pad(x2d, ((0, Mp - M), (0, 0)))
    Wp = jnp.pad(Wmat, ((0, 0), (0, Ncp - Nc)))
    bp = jnp.pad(bias4, (0, Ncp - Nc)).reshape(1, Ncp)

    # bf16 operands, f32 accumulate + f32 epilogue.
    x_bf = x2d.astype(jnp.bfloat16)
    w_bf = Wp.astype(jnp.bfloat16)

    # TODO(synk): for C_in large enough that a (tm, K)+(K, Ncp) pair exceeds
    # VMEM, add a K-tiled accumulator loop; unnecessary for DCT-sized layers.
    out = pl.pallas_call(
        _deconv_gemm_tanh_kernel,
        out_shape=jax.ShapeDtypeStruct((Mp, Ncp), jnp.float32),
        grid_spec=pltpu.PrefetchScalarGridSpec(
            num_scalar_prefetch=0,
            grid=(Mp // tm,),
            in_specs=[
                pl.BlockSpec((tm, K), lambda i: (i, 0)),
                pl.BlockSpec((K, Ncp), lambda i: (0, 0)),
                pl.BlockSpec((1, Ncp), lambda i: (0, 0)),
            ],
            out_specs=pl.BlockSpec((tm, Ncp), lambda i: (i, 0)),
        ),
        compiler_params=pltpu.CompilerParams(
            dimension_semantics=("parallel",)),
    )(x_bf, w_bf, bp)

    out = out[:M, :Nc]                                        # (M, 2*2*Cout)
    out = out.reshape(Nb, H, W, 2, 2, Cout)
    out = jnp.transpose(out, (0, 1, 3, 2, 4, 5)).reshape(Nb, 2 * H, 2 * W, Cout)

    if out_pad:
        # output_padding positions receive no kernel tap -> value is tanh(bias).
        Hn, Wn = 2 * H + out_pad, 2 * W + out_pad
        fill = jnp.tanh(b).reshape(1, 1, 1, Cout)
        out = jnp.pad(out, ((0, 0), (0, out_pad), (0, out_pad), (0, 0)))
        out = out.at[:, 2 * H:, :, :].set(
            jnp.broadcast_to(fill, (Nb, out_pad, Wn, Cout)))
        out = out.at[:, :, 2 * W:, :].set(
            jnp.broadcast_to(fill, (Nb, Hn, out_pad, Cout)))

    return jnp.transpose(out, (0, 3, 1, 2))                   # NHWC -> NCHW


# ----------------------------------------------------------------------------- pure-jnp reference
def deconv2x2_tanh_ref(x, w, b, out_pad=0):
    Nb, Cin, H, W = x.shape
    Cout = w.shape[1]
    y = jnp.einsum('nchw,cokl->nhwklo', x.astype(jnp.float32), w)
    y = jnp.transpose(y, (0, 1, 3, 2, 4, 5)).reshape(Nb, 2 * H, 2 * W, Cout)
    if out_pad:
        y = jnp.pad(y, ((0, 0), (0, out_pad), (0, out_pad), (0, 0)))
    y = jnp.tanh(y + b.reshape(1, 1, 1, Cout))
    return jnp.transpose(y, (0, 3, 1, 2))


# ----------------------------------------------------------------------------- main
if __name__ == "__main__":
    key = jax.random.PRNGKey(0)
    kx, kw, kb = jax.random.split(key, 3)

    # Small shapes consistent with DCT(128, 1) from CI_Unet_256: batch=2,
    # in_channels=128, 16x16 spatial, out_channels=1, output_padding=0.
    Nb, Cin, Cout, H, W = 2, 128, 1, 16, 16
    x = jax.random.normal(kx, (Nb, Cin, H, W), jnp.float32)
    bound = 1.0 / float(jnp.sqrt(Cin * 4.0))                  # torch-style init scale
    w = jax.random.uniform(kw, (Cin, Cout, 2, 2), jnp.float32, -bound, bound)
    b = jax.random.uniform(kb, (Cout,), jnp.float32, -bound, bound)

    fwd = jax.jit(functools.partial(deconv2x2_tanh, out_pad=0))
    out = jax.block_until_ready(fwd(x, w, b))

    assert out.shape == (Nb, Cout, 2 * H, 2 * W), out.shape
    assert bool(jnp.all(jnp.isfinite(out)))

    ref = deconv2x2_tanh_ref(x, w, b, 0)
    max_err = float(jnp.max(jnp.abs(out - ref)))
    assert max_err < 5e-2, f"max abs err {max_err}"
    print("KERNEL_OK")
</pallas_src>

<mosaic_0001>
module attributes {stable_mosaic.version = 11 : i64} {
  func.func @_deconv_gemm_tanh_kernel(%arg0: i32, %arg1: memref<256x128xbf16, #tpu.memory_space<vmem>>, %arg2: memref<128x128xbf16, #tpu.memory_space<vmem>>, %arg3: memref<1x128xf32, #tpu.memory_space<vmem>>, %arg4: memref<256x128xf32, #tpu.memory_space<vmem>>) attributes {dimension_semantics = [#tpu.dimension_semantics<parallel>], iteration_bounds = array<i64: 2>, scalar_prefetch = 0 : i64, scratch_operands = 0 : i64, tpu.core_type = #tpu.core_type<tc>, window_params = [{transform_indices = @transform_0, window_bounds = array<i64: 256, 128>}, {pipeline_mode = #tpu.pipeline_mode<synchronous>, transform_indices = @transform_1, window_bounds = array<i64: 128, 128>}, {pipeline_mode = #tpu.pipeline_mode<synchronous>, transform_indices = @transform_2, window_bounds = array<i64: 1, 128>}, {transform_indices = @transform_3, window_bounds = array<i64: 256, 128>}]} {
    %c0 = arith.constant 0 : index
    %c0_0 = arith.constant 0 : index
    %0 = vector.load %arg1[%c0, %c0_0] : memref<256x128xbf16, #tpu.memory_space<vmem>>, vector<256x128xbf16>
    %c0_1 = arith.constant 0 : index
    %c0_2 = arith.constant 0 : index
    %1 = vector.load %arg2[%c0_1, %c0_2] : memref<128x128xbf16, #tpu.memory_space<vmem>>, vector<128x128xbf16>
    %cst = arith.constant dense<0.000000e+00> : vector<256x128xf32>
    %2 = tpu.matmul %0, %1, %cst {dimension_numbers = #tpu.dot_dimension_numbers<[1], [0], [0], [1], [0, 0, 1, 1], [], []>} : vector<256x128xbf16>, vector<128x128xbf16>, vector<256x128xf32> -> vector<256x128xf32>
    %c0_3 = arith.constant 0 : index
    %c0_4 = arith.constant 0 : index
    %3 = vector.load %arg3[%c0_3, %c0_4] : memref<1x128xf32, #tpu.memory_space<vmem>>, vector<1x128xf32>
    %4 = vector.broadcast %3 : vector<1x128xf32> to vector<256x128xf32>
    %5 = arith.addf %2, %4 : vector<256x128xf32>
    %6 = math.tanh %5 : vector<256x128xf32>
    %c0_5 = arith.constant 0 : index
    %c0_6 = arith.constant 0 : index
    %7 = vector.load %arg4[%c0_5, %c0_6] : memref<256x128xf32, #tpu.memory_space<vmem>>, vector<256x128xf32>
    tpu.vector_store %arg4[%c0_5, %c0_6], %6 {strides = array<i32>} : memref<256x128xf32, #tpu.memory_space<vmem>>, vector<256x128xf32>,
    return
  }
  func.func @transform_0(%arg0: i32) -> (i32, i32) {
    %c0_i32 = arith.constant 0 : i32
    %c0_i32_0 = arith.constant 0 : i32
    return %arg0, %c0_i32 : i32, i32
  }
  func.func @transform_1(%arg0: i32) -> (i32, i32) {
    %c0_i32 = arith.constant 0 : i32
    %c0_i32_0 = arith.constant 0 : i32
    %c0_i32_1 = arith.constant 0 : i32
    return %c0_i32, %c0_i32_0 : i32, i32
  }
  func.func @transform_2(%arg0: i32) -> (i32, i32) {
    %c0_i32 = arith.constant 0 : i32
    %c0_i32_0 = arith.constant 0 : i32
    %c0_i32_1 = arith.constant 0 : i32
    return %c0_i32, %c0_i32_0 : i32, i32
  }
  func.func @transform_3(%arg0: i32) -> (i32, i32) {
    %c0_i32 = arith.constant 0 : i32
    %c0_i32_0 = arith.constant 0 : i32
    return %arg0, %c0_i32 : i32, i32
  }
}

</mosaic_0001>

<bundles_post_ra>
// kernel: deconv2x2_tanh.1
= control target key start
LH: loop header
LB: loop body
LE: loop exit
PB: predicated region body
PF: predicated region fallthrough
CT: control target
= control target key end

     0   :  { %s903_s12 = smov 0   ;;  %s1037_s0 = inlined_call_operand.vmem [shape: bf16[512,128], index: 0, kind: input, shape index: {}]   ;;  %s1038_s1 = inlined_call_operand.vmem [shape: bf16[128,128], index: 1, kind: input, shape index: {}]   ;;  %s1039_s2 = inlined_call_operand.vmem [shape: f32[1,128], index: 2, kind: input, shape index: {}]   ;;  %s1040_s3 = inlined_call_operand.vmem [shape: f32[512,128], index: 3, kind: output, shape index: {}]  }
   0x1 LB: > { %s655_s13 = sadd.s32 4294967295, %s881_s12   ;;  %p659_p0 = scmp.ge.s32.totalorder %s881_s12, 1  ;;  %s881_s12 = sphi %s903_s12, %s13_s12  }
   0x2   : > { %p138_p1 = scmp.lt.s32.totalorder %s881_s12, 3 }
   0x4   : > { %p139_p2 = pnand %p659_p0, %p138_p1 }
   0x5   : > { %v787_v0 = vld [vmem:[%s1038_s1] sm:$0xff] (!%p139_p2)   ;;  %s660_s16 = sshll.u32 (!%p139_p2), %s655_s13, 5  ;;  %v788_v1 = vld [vmem:[%s1038_s1 + $0x8] sm:$0xff] (!%p139_p2)   ;;  %v789_v2 = vld [vmem:[%s1038_s1 + $0x10] sm:$0xff] (!%p139_p2)  }
   0x6   : > { %142 = sbr.rel (%p139_p2) target bundleno = 298 (0x12a), region = 32  ;;  %p163_p3 = scmp.lt.s32.totalorder (!%p139_p2), %s660_s16, 63  ;;  %715 = vmatprep.subr.bf16.mxu0 (!%p139_p2), %v787_v0  ;;  %763 = vmatprep.subr.bf16.mxu1 (!%p139_p2), %v787_v0  ;;  %v790_v3 = vld [vmem:[%s1038_s1 + $0x18] sm:$0xff] (!%p139_p2)   ;;  %v791_v6 = vld [vmem:[%s1038_s1 + $0x20] sm:$0xff] (!%p139_p2)   ;;  %v792_v7 = vld [vmem:[%s1038_s1 + $0x28] sm:$0xff] (!%p139_p2)  }
   0x7   : > { %716 = vmatpush3.bf16.msra.mxu0 (!%p139_p2), %v787_v0  ;;  %771 = vmatpush3.bf16.msra.mxu1 (!%p139_p2), %v787_v0  ;;  %v793_v8 = vld [vmem:[%s1038_s1 + $0x30] sm:$0xff] (!%p139_p2)   ;;  %v794_v9 = vld [vmem:[%s1038_s1 + $0x38] sm:$0xff] (!%p139_p2)   ;;  %v962_v24 = vld [vmem:[%s1039_s2] ss:$0 sm:$0xff] (!%p139_p2) }
   0x8   : > { %717 = vmatprep.subr.bf16.mxu0 (!%p139_p2), %v788_v1  ;;  %764 = vmatprep.subr.bf16.mxu1 (!%p139_p2), %v788_v1 }
   0xb   : > { %718 = vmatpush3.bf16.msra.mxu0 (!%p139_p2), %v788_v1  ;;  %772 = vmatpush3.bf16.msra.mxu1 (!%p139_p2), %v788_v1 }
   0xc   : > { %719 = vmatprep.subr.bf16.mxu0 (!%p139_p2), %v789_v2  ;;  %765 = vmatprep.subr.bf16.mxu1 (!%p139_p2), %v789_v2 }
   0xd   : > { %s1042_s16 = smov (!%p163_p3, %s660_s16), 63 }
   0xe   : > { %s661_s21 = sshll.u32 %s1042_s16, 2  ;;  %s663_s10 = sshll.u32 %s1042_s16, 3 }
   0xf   : > { %s926_s24 = scalar_lea.vmem %s1037_s0, %s661_s21  ;;  %720 = vmatpush3.bf16.msra.mxu0 %v789_v2  ;;  %773 = vmatpush3.bf16.msra.mxu1 %v789_v2  ;;  %s980_s14 = scalar_lea.vmem %s1040_s3, %s663_s10 }
  0x10   : > { %v795_v4 = vld [vmem:[%s926_s24] sm:$0xff]   ;;  %721 = vmatprep.subr.bf16.mxu0 %v790_v3  ;;  %766 = vmatprep.subr.bf16.mxu1 %v790_v3  ;;  %v797_v10 = vld [vmem:[%s926_s24 + $0x8] sm:$0xff]   ;;  %v799_v12 = vld [vmem:[%s926_s24 + $0x10] sm:$0xff]  }
  0x11   : > { %v796_v5 = vld [vmem:[%s926_s24 + $0x40] sm:$0xff]   ;;  %731 = vmatprep.mubr.bf16.mxu0 %v795_v4  ;;  %v798_v11 = vld [vmem:[%s926_s24 + $0x48] sm:$0xff]   ;;  %v800_v13 = vld [vmem:[%s926_s24 + $0x50] sm:$0xff]  }
  0x12   : > { %747 = vmatprep.mubr.bf16.mxu1 %v796_v5  ;;  %v801_v14 = vld [vmem:[%s926_s24 + $0x18] sm:$0xff]   ;;  %v803_v16 = vld [vmem:[%s926_s24 + $0x20] sm:$0xff]   ;;  %v805_v18 = vld [vmem:[%s926_s24 + $0x28] sm:$0xff]  }
  0x13   : > { %722 = vmatpush3.bf16.msra.mxu0 %v790_v3  ;;  %774 = vmatpush3.bf16.msra.mxu1 %v790_v3  ;;  %v802_v15 = vld [vmem:[%s926_s24 + $0x58] sm:$0xff]   ;;  %v804_v17 = vld [vmem:[%s926_s24 + $0x60] sm:$0xff]   ;;  %v806_v19 = vld [vmem:[%s926_s24 + $0x68] sm:$0xff]  }
  0x14   : > { %723 = vmatprep.subr.bf16.mxu0 %v791_v6  ;;  %767 = vmatprep.subr.bf16.mxu1 %v791_v6  ;;  %v807_v20 = vld [vmem:[%s926_s24 + $0x30] sm:$0xff]   ;;  %v809_v22 = vld [vmem:[%s926_s24 + $0x38] sm:$0xff]  }
  0x15   : > { %v808_v21 = vld [vmem:[%s926_s24 + $0x70] sm:$0xff]   ;;  %v810_v23 = vld [vmem:[%s926_s24 + $0x78] sm:$0xff]  }
  0x17   : > { %724 = vmatpush3.bf16.msra.mxu0 %v791_v6  ;;  %775 = vmatpush3.bf16.msra.mxu1 %v791_v6 }
  0x18   : > { %725 = vmatprep.subr.bf16.mxu0 %v792_v7  ;;  %768 = vmatprep.subr.bf16.mxu1 %v792_v7 }
  0x1b   : > { %726 = vmatpush3.bf16.msra.mxu0 %v792_v7  ;;  %776 = vmatpush3.bf16.msra.mxu1 %v792_v7 }
  0x1c   : > { %727 = vmatprep.subr.bf16.mxu0 %v793_v8  ;;  %769 = vmatprep.subr.bf16.mxu1 %v793_v8 }
  0x1f   : > { %728 = vmatpush3.bf16.msra.mxu0 %v793_v8  ;;  %777 = vmatpush3.bf16.msra.mxu1 %v793_v8 }
  0x20   : > { %729 = vmatprep.subr.bf16.mxu0 %v794_v9  ;;  %770 = vmatprep.subr.bf16.mxu1 %v794_v9 }
  0x23   : > { %730 = vmatpush3.bf16.msra.mxu0 %v794_v9  ;;  %778 = vmatpush3.bf16.msra.mxu1 %v794_v9 }
  0x26   : > { %732 = vmatmul.mubr.bf16.vlgmr.msra.gmra.mrb[0].mxu0 %v797_v10  ;;  %748 = vmatmul.mubr.bf16.vlgmr.msra.gmra.mrb[0].mxu1 %v798_v11 }
  0x27   : > { %735 = vmatprep.mubr.bf16.mxu0 %v799_v12  ;;  %751 = vmatprep.mubr.bf16.mxu1 %v800_v13 }
  0x2e   : > { %736 = vmatmul.mubr.bf16.gmra.mrb[4].mxu0 %v801_v14  ;;  %752 = vmatmul.mubr.bf16.gmra.mrb[4].mxu1 %v802_v15 }
  0x2f   : > { %739 = vmatprep.mubr.bf16.mxu0 %v803_v16  ;;  %755 = vmatprep.mubr.bf16.mxu1 %v804_v17 }
  0x36   : > { %740 = vmatmul.mubr.bf16.gmra.mrb[8].mxu0 %v805_v18  ;;  %756 = vmatmul.mubr.bf16.gmra.mrb[8].mxu1 %v806_v19 }
  0x37   : > { %743 = vmatprep.mubr.bf16.mxu0 %v807_v20  ;;  %759 = vmatprep.mubr.bf16.mxu1 %v808_v21 }
  0x3e   : > { %744 = vmatmul.mubr.bf16.gmra.mrb[12].mxu0 %v809_v22  ;;  %760 = vmatmul.mubr.bf16.gmra.mrb[12].mxu1 %v810_v23 }
  0xf9   : > { %v733_v25 = vpop.f32.mrb[0].mxu0  ;;  %v749_v26 = vpop.f32.mrb[0].mxu1 }
  0xfa   : > { %v417_v27 = vadd.f32 %v733_v25, %v962_v24  ;;  %v481_v28 = vadd.f32 %v749_v26, %v962_v24  ;;  %v408_v29 = vpop.f32.mrb[1].mxu0  ;;  %v472_v30 = vpop.f32.mrb[1].mxu1 }
  0xfb   : > { %v409_v31 = vadd.f32 %v962_v24, %v408_v29  ;;  %v473_v32 = vadd.f32 %v962_v24, %v472_v30  ;;  %v734_v33 = vpop.f32.mrb[2].mxu0  ;;  %v750_v34 = vpop.f32.mrb[2].mxu1 }
  0xfc   : > { %811 = vtanh.f32 %v417_v27  ;;  %v420_v35 = vadd.f32 %v734_v33, %v962_v24  ;;  %v411_v36 = vpop.f32.mrb[3].mxu0  ;;  %v475_v37 = vpop.f32.mrb[3].mxu1  ;;  %v484_v38 = vadd.f32 %v750_v34, %v962_v24 }
  0xfd   : > { %813 = vtanh.f32 %v481_v28  ;;  %v412_v39 = vadd.f32 %v962_v24, %v411_v36  ;;  %v476_v40 = vadd.f32 %v962_v24, %v475_v37 }
  0xfe   : > { %815 = vtanh.f32 %v409_v31 }
  0xff   : > { %817 = vtanh.f32 %v473_v32 }
 0x100   : > { %819 = vtanh.f32 %v420_v35 }
 0x101   : > { %821 = vtanh.f32 %v484_v38  ;;  %v737_v41 = vpop.f32.mrb[4].mxu0  ;;  %v753_v42 = vpop.f32.mrb[4].mxu1 }
 0x102   : > { %823 = vtanh.f32 %v412_v39  ;;  %v433_v43 = vadd.f32 %v737_v41, %v962_v24  ;;  %v497_v44 = vadd.f32 %v753_v42, %v962_v24  ;;  %v424_v45 = vpop.f32.mrb[5].mxu0  ;;  %v488_v46 = vpop.f32.mrb[5].mxu1 }
 0x103   : > { %825 = vtanh.f32 %v476_v40  ;;  %v425_v47 = vadd.f32 %v962_v24, %v424_v45  ;;  %v489_v48 = vadd.f32 %v962_v24, %v488_v46  ;;  %v738_v49 = vpop.f32.mrb[6].mxu0  ;;  %v754_v50 = vpop.f32.mrb[6].mxu1 }
 0x104   : > { %827 = vtanh.f32 %v433_v43  ;;  %v436_v51 = vadd.f32 %v738_v49, %v962_v24  ;;  %v427_v52 = vpop.f32.mrb[7].mxu0  ;;  %v491_v53 = vpop.f32.mrb[7].mxu1  ;;  %v500_v54 = vadd.f32 %v754_v50, %v962_v24 }
 0x105   : > { %829 = vtanh.f32 %v497_v44  ;;  %v428_v56 = vadd.f32 %v962_v24, %v427_v52  ;;  %v492_v58 = vadd.f32 %v962_v24, %v491_v53 }
 0x106   : > { %v812_v55 = vpop.eup %811  ;;  %831 = vtanh.f32 %v425_v47 }
 0x107   : > { %v814_v57 = vpop.eup %813  ;;  %569 = vst [vmem:[%s980_s14 + $0x10] sm:$0xff] %v812_v55  ;;  %833 = vtanh.f32 %v489_v48 }
 0x108   : > { %v816_v59 = vpop.eup %815  ;;  %585 = vst [vmem:[%s980_s14 + $0x90] sm:$0xff] %v814_v57  ;;  %835 = vtanh.f32 %v436_v51 }
 0x109   : > { %v818_v60 = vpop.eup %817  ;;  %567 = vst [vmem:[%s980_s14] sm:$0xff] %v816_v59  ;;  %837 = vtanh.f32 %v500_v54  ;;  %v741_v61 = vpop.f32.mrb[8].mxu0 }
 0x10a   : > { %v757_v62 = vpop.f32.mrb[8].mxu1  ;;  %v820_v63 = vpop.eup %819  ;;  %583 = vst [vmem:[%s980_s14 + $0x80] sm:$0xff] %v818_v60  ;;  %839 = vtanh.f32 %v428_v56  ;;  %v449_v0 = vadd.f32 %v741_v61, %v962_v24 }
 0x10b   : > { %v513_v1 = vadd.f32 %v757_v62, %v962_v24  ;;  %v440_v2 = vpop.f32.mrb[9].mxu0  ;;  %v504_v3 = vpop.f32.mrb[9].mxu1  ;;  %570 = vst [vmem:[%s980_s14 + $0x18] sm:$0xff] %v820_v63  ;;  %841 = vtanh.f32 %v492_v58 }
 0x10c   : > { %v822_v4 = vpop.eup %821  ;;  %v441_v5 = vadd.f32 %v962_v24, %v440_v2  ;;  %v505_v6 = vadd.f32 %v962_v24, %v504_v3  ;;  %v742_v7 = vpop.f32.mrb[10].mxu0  ;;  %843 = vtanh.f32 %v449_v0 }
 0x10d   : > { %v758_v8 = vpop.f32.mrb[10].mxu1  ;;  %v824_v9 = vpop.eup %823  ;;  %586 = vst [vmem:[%s980_s14 + $0x98] sm:$0xff] %v822_v4  ;;  %v452_v10 = vadd.f32 %v742_v7, %v962_v24  ;;  %845 = vtanh.f32 %v513_v1 }
 0x10e   : > { %v443_v11 = vpop.f32.mrb[11].mxu0  ;;  %v507_v12 = vpop.f32.mrb[11].mxu1  ;;  %568 = vst [vmem:[%s980_s14 + $0x8] sm:$0xff] %v824_v9  ;;  %v516_v14 = vadd.f32 %v758_v8, %v962_v24  ;;  %847 = vtanh.f32 %v441_v5 }
 0x10f   : > { %v826_v13 = vpop.eup %825  ;;  %v444_v16 = vadd.f32 %v962_v24, %v443_v11  ;;  %849 = vtanh.f32 %v505_v6  ;;  %v508_v18 = vadd.f32 %v962_v24, %v507_v12 }
 0x110   : > { %v828_v15 = vpop.eup %827  ;;  %584 = vst [vmem:[%s980_s14 + $0x88] sm:$0xff] %v826_v13  ;;  %851 = vtanh.f32 %v452_v10 }
 0x111   : > { %v830_v17 = vpop.eup %829  ;;  %573 = vst [vmem:[%s980_s14 + $0x30] sm:$0xff] %v828_v15  ;;  %853 = vtanh.f32 %v516_v14  ;;  %v745_v21 = vpop.f32.mrb[12].mxu0 }
 0x112   : > { %v832_v19 = vpop.eup %831  ;;  %589 = vst [vmem:[%s980_s14 + $0xb0] sm:$0xff] %v830_v17  ;;  %v761_v22 = vpop.f32.mrb[12].mxu1  ;;  %855 = vtanh.f32 %v444_v16  ;;  %v465_v25 = vadd.f32 %v745_v21, %v962_v24 }
 0x113   : > { %v834_v20 = vpop.eup %833  ;;  %571 = vst [vmem:[%s980_s14 + $0x20] sm:$0xff] %v832_v19  ;;  %v529_v26 = vadd.f32 %v761_v22, %v962_v24  ;;  %v456_v27 = vpop.f32.mrb[13].mxu0  ;;  %857 = vtanh.f32 %v508_v18 }
 0x114   : > { %v836_v23 = vpop.eup %835  ;;  %587 = vst [vmem:[%s980_s14 + $0xa0] sm:$0xff] %v834_v20  ;;  %v520_v28 = vpop.f32.mrb[13].mxu1  ;;  %v457_v30 = vadd.f32 %v962_v24, %v456_v27  ;;  %859 = vtanh.f32 %v465_v25 }
 0x115   : > { %v838_v29 = vpop.eup %837  ;;  %574 = vst [vmem:[%s980_s14 + $0x38] sm:$0xff] %v836_v23  ;;  %v521_v31 = vadd.f32 %v962_v24, %v520_v28  ;;  %v746_v32 = vpop.f32.mrb[14].mxu0  ;;  %861 = vtanh.f32 %v529_v26 }
 0x116   : > { %v762_v33 = vpop.f32.mrb[14].mxu1  ;;  %v840_v34 = vpop.eup %839  ;;  %590 = vst [vmem:[%s980_s14 + $0xb8] sm:$0xff] %v838_v29  ;;  %v468_v35 = vadd.f32 %v746_v32, %v962_v24  ;;  %863 = vtanh.f32 %v457_v30 }
 0x117   : > { %v459_v36 = vpop.f32.mrb[15].mxu0  ;;  %v523_v37 = vpop.f32.mrb[15].mxu1  ;;  %572 = vst [vmem:[%s980_s14 + $0x28] sm:$0xff] %v840_v34  ;;  %v532_v39 = vadd.f32 %v762_v33, %v962_v24  ;;  %865 = vtanh.f32 %v521_v31 }
 0x118   : > { %v842_v38 = vpop.eup %841  ;;  %v460_v41 = vadd.f32 %v962_v24, %v459_v36  ;;  %v524_v43 = vadd.f32 %v962_v24, %v523_v37  ;;  %867 = vtanh.f32 %v468_v35 }
 0x119   : > { %v844_v40 = vpop.eup %843  ;;  %588 = vst [vmem:[%s980_s14 + $0xa8] sm:$0xff] %v842_v38  ;;  %869 = vtanh.f32 %v532_v39 }
 0x11a   : > { %v846_v42 = vpop.eup %845  ;;  %577 = vst [vmem:[%s980_s14 + $0x50] sm:$0xff] %v844_v40  ;;  %871 = vtanh.f32 %v460_v41 }
 0x11b   : > { %v848_v44 = vpop.eup %847  ;;  %593 = vst [vmem:[%s980_s14 + $0xd0] sm:$0xff] %v846_v42  ;;  %873 = vtanh.f32 %v524_v43 }
 0x11c   : > { %v850_v45 = vpop.eup %849  ;;  %575 = vst [vmem:[%s980_s14 + $0x40] sm:$0xff] %v848_v44 }
 0x11d   : > { %v852_v46 = vpop.eup %851  ;;  %591 = vst [vmem:[%s980_s14 + $0xc0] sm:$0xff] %v850_v45 }
 0x11e   : > { %v854_v47 = vpop.eup %853  ;;  %578 = vst [vmem:[%s980_s14 + $0x58] sm:$0xff] %v852_v46 }
 0x11f   : > { %v856_v24 = vpop.eup %855  ;;  %594 = vst [vmem:[%s980_s14 + $0xd8] sm:$0xff] %v854_v47 }
 0x120   : > { %v858_v48 = vpop.eup %857  ;;  %576 = vst [vmem:[%s980_s14 + $0x48] sm:$0xff] %v856_v24 }
 0x121   : > { %v860_v49 = vpop.eup %859  ;;  %592 = vst [vmem:[%s980_s14 + $0xc8] sm:$0xff] %v858_v48 }
 0x122   : > { %v862_v50 = vpop.eup %861  ;;  %581 = vst [vmem:[%s980_s14 + $0x70] sm:$0xff] %v860_v49 }
 0x123   : > { %v864_v51 = vpop.eup %863  ;;  %597 = vst [vmem:[%s980_s14 + $0xf0] sm:$0xff] %v862_v50 }
 0x124   : > { %v866_v52 = vpop.eup %865  ;;  %579 = vst [vmem:[%s980_s14 + $0x60] sm:$0xff] %v864_v51 }
 0x125   : > { %v868_v53 = vpop.eup %867  ;;  %595 = vst [vmem:[%s980_s14 + $0xe0] sm:$0xff] %v866_v52 }
 0x126   : > { %v870_v54 = vpop.eup %869  ;;  %582 = vst [vmem:[%s980_s14 + $0x78] sm:$0xff] %v868_v53 }
 0x127   : > { %v872_v55 = vpop.eup %871  ;;  %598 = vst [vmem:[%s980_s14 + $0xf8] sm:$0xff] %v870_v54 }
 0x128   : > { %v874_v56 = vpop.eup %873  ;;  %580 = vst [vmem:[%s980_s14 + $0x68] sm:$0xff] %v872_v55 }
 0x129   : > { %596 = vst [vmem:[%s980_s14 + $0xe8] sm:$0xff] %v874_v56 }
 0x12a PF: > { %s13_s12 = sadd.s32 1, %s881_s12  }
 0x12b   : > { %p10_p4 = scmp.ge.s32.totalorder %s13_s12, 4  }
 0x12d   :  { %12 = sbr.rel (!%p10_p4) target bundleno = 1 (0x1), region = 62 }

</bundles_post_ra>
